<compile_context>
chip_gen: v5e
topology: v5e:2x2
jax: 0.10.0
libtpu: 0.0.40
codegen_flags: <defaults>
</compile_context>

<pallas_src>
import jax
import jax.numpy as jnp
from jax.experimental import pallas as pl
from jax.experimental.pallas import tpu as pltpu


def _leaky_relu(x, slope=0.2):
    return jnp.where(x >= 0, x, slope * x)


def _stats_kernel(x_ref, w1_ref, b1_ref, w2_ref, stats_ref):
    """Pass 1: accumulate per-channel sum / sumsq of h2 for one batch slot."""
    x = x_ref[...].astype(jnp.bfloat16)                             # (Cin, T)
    h1 = jnp.dot(w1_ref[...], x, preferred_element_type=jnp.float32)
    h1 = _leaky_relu(h1 + b1_ref[...])                              # (ndf, T) f32
    h2 = jnp.dot(w2_ref[...], h1.astype(jnp.bfloat16),
                 preferred_element_type=jnp.float32)                # (ndf2, T) f32

    s = jnp.sum(h2, axis=1, keepdims=True)                          # (ndf2, 1)
    sq = jnp.sum(h2 * h2, axis=1, keepdims=True)                    # (ndf2, 1)

    @pl.when(pl.program_id(1) == 0)
    def _():
        stats_ref[...] = jnp.zeros_like(stats_ref)

    stats_ref[...] += jnp.concatenate([s, sq], axis=1)              # (ndf2, 2)


def _apply_kernel(x_ref, w1_ref, b1_ref, w2_ref, scale_ref, shift_ref, w3_ref,
                  o_ref):
    """Pass 2: recompute h2 per tile, apply folded BN + LReLU + final conv."""
    x = x_ref[...].astype(jnp.bfloat16)                             # (Cin, T)
    h1 = jnp.dot(w1_ref[...], x, preferred_element_type=jnp.float32)
    h1 = _leaky_relu(h1 + b1_ref[...])                              # (ndf, T) f32
    h2 = jnp.dot(w2_ref[...], h1.astype(jnp.bfloat16),
                 preferred_element_type=jnp.float32)                # (ndf2, T) f32
    h2 = _leaky_relu(h2 * scale_ref[...] + shift_ref[...])          # folded BN
    out = jnp.dot(w3_ref[...], h2.astype(jnp.bfloat16),
                  preferred_element_type=jnp.float32)               # (1, T)
    o_ref[...] = out.astype(o_ref.dtype)


def pixel_discriminator(x_nchw, params, *, tile_m=4096):
    """x_nchw: (N, Cin, H, W) float32.  Returns (N, 1, H, W) float32.

    tile_m: desired pixel tile (multiple of 128).  4096 is a good default on
    all generations; sweep 4096-8192 on v6e/v7x, cap ~4096 on v5e.
    """
    w1, b1, w2, gamma, beta, w3 = params
    n, cin, h, w = x_nchw.shape
    hw = h * w
    m = n * hw
    ndf = w1.shape[0]
    ndf2 = w2.shape[0]

    # --- Tile the per-image pixel axis. Prefer a tile dividing H*W so the ---
    # --- wrapper never materializes a padded copy of x.                   ---
    tile_m = max(128, (tile_m // 128) * 128)
    hw128 = pl.cdiv(hw, 128) * 128
    tile_hw = min(tile_m, hw128)
    for cand in range(tile_hw, 0, -128):
        if hw % cand == 0:
            tile_hw = cand
            break
    hw_pad = pl.cdiv(hw, tile_hw) * tile_hw
    num_tiles = hw_pad // tile_hw

    # Free reshape: NCHW -> (N, Cin, H*W); pixels on the fast 128-lane axis.
    x3 = x_nchw.reshape(n, cin, hw)
    if hw_pad != hw:
        x3 = jnp.pad(x3, ((0, 0), (0, 0), (0, hw_pad - hw)))

    w1_bf = w1.astype(jnp.bfloat16)
    w2_bf = w2.astype(jnp.bfloat16)
    w3_bf = w3.astype(jnp.bfloat16)

    vmem_limit = 32 * 1024 * 1024

    # ---- Pass 1: per-channel, per-batch sum / sumsq of h2 (BN stats). ----
    stats = pl.pallas_call(
        _stats_kernel,
        out_shape=jax.ShapeDtypeStruct((n, ndf2, 2), jnp.float32),
        grid=(n, num_tiles),
        in_specs=[
            pl.BlockSpec((None, cin, tile_hw), lambda b, i: (b, 0, i)),
            pl.BlockSpec((ndf, cin), lambda b, i: (0, 0)),
            pl.BlockSpec((ndf, 1), lambda b, i: (0, 0)),
            pl.BlockSpec((ndf2, ndf), lambda b, i: (0, 0)),
        ],
        out_specs=pl.BlockSpec((None, ndf2, 2), lambda b, i: (b, 0, 0)),
        compiler_params=pltpu.CompilerParams(
            dimension_semantics=("parallel", "arbitrary"),
            vmem_limit_bytes=vmem_limit),
    )(x3, w1_bf, b1, w2_bf)

    # ---- Tiny per-channel fold in XLA (biased variance, eps=1e-5). ----
    stats_sum = jnp.sum(stats, axis=0)                              # (ndf2, 2)
    ssum = stats_sum[:, 0:1]
    ssq = stats_sum[:, 1:2]

    n_pad_total = n * (hw_pad - hw)
    if n_pad_total:
        # Padded columns (x = 0) each contribute exactly c = W2 @ LReLU(b1);
        # subtract their contribution analytically instead of masking per tile.
        c = jnp.dot(w2_bf, _leaky_relu(b1).astype(jnp.bfloat16),
                    preferred_element_type=jnp.float32)             # (ndf2, 1)
        ssum = ssum - n_pad_total * c
        ssq = ssq - n_pad_total * (c * c)

    mean = ssum / m                                                 # (ndf2, 1)
    var = jnp.maximum(ssq / m - mean * mean, 0.0)                   # clamp >= 0
    inv = jax.lax.rsqrt(var + 1e-5)
    scale = gamma * inv
    shift = beta - mean * scale

    # ---- Pass 2: normalize + LReLU + final 1x1 conv, lane-dense output. ----
    out = pl.pallas_call(
        _apply_kernel,
        out_shape=jax.ShapeDtypeStruct((n, 1, hw_pad), jnp.float32),
        grid=(n, num_tiles),
        in_specs=[
            pl.BlockSpec((None, cin, tile_hw), lambda b, i: (b, 0, i)),
            pl.BlockSpec((ndf, cin), lambda b, i: (0, 0)),
            pl.BlockSpec((ndf, 1), lambda b, i: (0, 0)),
            pl.BlockSpec((ndf2, ndf), lambda b, i: (0, 0)),
            pl.BlockSpec((ndf2, 1), lambda b, i: (0, 0)),
            pl.BlockSpec((ndf2, 1), lambda b, i: (0, 0)),
            pl.BlockSpec((1, ndf2), lambda b, i: (0, 0)),
        ],
        out_specs=pl.BlockSpec((None, 1, tile_hw), lambda b, i: (b, 0, i)),
        compiler_params=pltpu.CompilerParams(
            dimension_semantics=("parallel", "parallel"),
            vmem_limit_bytes=vmem_limit),
    )(x3, w1_bf, b1, w2_bf, scale, shift, w3_bf)

    out = out[:, :, :hw]
    return out.reshape(n, 1, h, w)


def init_params(key, input_nc, ndf=64):
    """Synthetic params in PyTorch conv-weight layout (Cout, Cin), squeezed."""
    k1, k2, k3, kb = jax.random.split(key, 4)
    w1 = 0.05 * jax.random.normal(k1, (ndf, input_nc), jnp.float32)
    b1 = 0.05 * jax.random.normal(kb, (ndf, 1), jnp.float32)
    w2 = 0.05 * jax.random.normal(k2, (ndf * 2, ndf), jnp.float32)    # bias=False
    gamma = jnp.ones((ndf * 2, 1), jnp.float32)                       # BN affine init
    beta = jnp.zeros((ndf * 2, 1), jnp.float32)
    w3 = 0.05 * jax.random.normal(k3, (1, ndf * 2), jnp.float32)      # bias=False
    return (w1, b1, w2, gamma, beta, w3)


def _reference(x_nchw, params):
    """Pure-JAX reference with the same bf16 matmul casts (f32 elsewhere)."""
    w1, b1, w2, gamma, beta, w3 = params
    n, cin, h, w = x_nchw.shape
    f32 = jnp.float32
    x = jnp.transpose(x_nchw, (1, 0, 2, 3)).reshape(cin, -1).astype(jnp.bfloat16)
    h1 = jnp.dot(w1.astype(jnp.bfloat16), x, preferred_element_type=f32) + b1
    h1 = jnp.where(h1 >= 0, h1, 0.2 * h1)
    h2 = jnp.dot(w2.astype(jnp.bfloat16), h1.astype(jnp.bfloat16),
                 preferred_element_type=f32)
    mu = h2.mean(axis=1, keepdims=True)
    var = ((h2 - mu) ** 2).mean(axis=1, keepdims=True)
    h2 = (h2 - mu) * jax.lax.rsqrt(var + 1e-5) * gamma + beta
    h2 = jnp.where(h2 >= 0, h2, 0.2 * h2)
    out = jnp.dot(w3.astype(jnp.bfloat16), h2.astype(jnp.bfloat16),
                  preferred_element_type=f32)
    return jnp.transpose(out.reshape(1, n, h, w), (1, 0, 2, 3))


if __name__ == "__main__":
    key = jax.random.PRNGKey(0)
    kx, kp = jax.random.split(key)

    N, Cin, NDF = 2, 4, 64
    params = init_params(kp, Cin, NDF)

    # Test 1: default config (H*W divisible by 128 -> no padding, 1 tile/image).
    x = jax.random.normal(kx, (N, Cin, 16, 16), jnp.float32)
    out = jax.block_until_ready(pixel_discriminator(x, params))
    ref = jax.block_until_ready(_reference(x, params))
    assert out.shape == (N, 1, 16, 16), out.shape
    err = float(jnp.max(jnp.abs(out - ref)))
    assert jnp.allclose(out, ref, atol=2e-3, rtol=2e-3), err

    # Test 2: H*W = 324 not a multiple of 128 and tile_m=128 -> 3 tiles/image,
    # padded columns, exercising multi-tile stats accumulation and the
    # analytic padding correction in the BN fold.
    x2 = jax.random.normal(kx, (N, Cin, 18, 18), jnp.float32)
    out2 = jax.block_until_ready(pixel_discriminator(x2, params, tile_m=128))
    ref2 = jax.block_until_ready(_reference(x2, params))
    assert out2.shape == (N, 1, 18, 18), out2.shape
    err2 = float(jnp.max(jnp.abs(out2 - ref2)))
    assert jnp.allclose(out2, ref2, atol=2e-3, rtol=2e-3), err2

    print("KERNEL_OK")
</pallas_src>

<mosaic_0001>
module attributes {stable_mosaic.version = 11 : i64} {
  func.func @_stats_kernel(%arg0: i32, %arg1: i32, %arg2: memref<1x4x256xf32, #tpu.memory_space<vmem>>, %arg3: memref<64x4xbf16, #tpu.memory_space<vmem>>, %arg4: memref<64x1xf32, #tpu.memory_space<vmem>>, %arg5: memref<128x64xbf16, #tpu.memory_space<vmem>>, %arg6: memref<1x128x2xf32, #tpu.memory_space<vmem>>) attributes {dimension_semantics = [#tpu.dimension_semantics<parallel>, #tpu.dimension_semantics<arbitrary>], iteration_bounds = array<i64: 2, 1>, scalar_prefetch = 0 : i64, scratch_operands = 0 : i64, tpu.core_type = #tpu.core_type<tc>, window_params = [{transform_indices = @transform_0, window_bounds = array<i64: 1, 4, 256>}, {pipeline_mode = #tpu.pipeline_mode<synchronous>, transform_indices = @transform_1, window_bounds = array<i64: 64, 4>}, {pipeline_mode = #tpu.pipeline_mode<synchronous>, transform_indices = @transform_2, window_bounds = array<i64: 64, 1>}, {pipeline_mode = #tpu.pipeline_mode<synchronous>, transform_indices = @transform_3, window_bounds = array<i64: 128, 64>}, {transform_indices = @transform_4, window_bounds = array<i64: 1, 128, 2>}]} {
    %c0 = arith.constant 0 : index
    %c0_0 = arith.constant 0 : index
    %c0_1 = arith.constant 0 : index
    %0 = vector.load %arg2[%c0, %c0_0, %c0_1] : memref<1x4x256xf32, #tpu.memory_space<vmem>>, vector<1x4x256xf32>
    %1 = vector.shape_cast %0 : vector<1x4x256xf32> to vector<4x256xf32>
    %2 = arith.truncf %1 : vector<4x256xf32> to vector<4x256xbf16>
    %c0_2 = arith.constant 0 : index
    %c0_3 = arith.constant 0 : index
    %3 = vector.load %arg3[%c0_2, %c0_3] : memref<64x4xbf16, #tpu.memory_space<vmem>>, vector<64x4xbf16>
    %cst = arith.constant dense<0.000000e+00> : vector<64x256xf32>
    %4 = tpu.matmul %3, %2, %cst {dimension_numbers = #tpu.dot_dimension_numbers<[1], [0], [0], [1], [0, 0, 1, 1], [], []>} : vector<64x4xbf16>, vector<4x256xbf16>, vector<64x256xf32> -> vector<64x256xf32>
    %c0_4 = arith.constant 0 : index
    %c0_5 = arith.constant 0 : index
    %5 = vector.load %arg4[%c0_4, %c0_5] : memref<64x1xf32, #tpu.memory_space<vmem>>, vector<64x1xf32>
    %6 = vector.broadcast %5 : vector<64x1xf32> to vector<64x256xf32>
    %7 = arith.addf %4, %6 : vector<64x256xf32>
    %cst_6 = arith.constant 0.000000e+00 : f32
    %8 = vector.broadcast %cst_6 : f32 to vector<64x256xf32>
    %9 = arith.cmpf oge, %7, %8 : vector<64x256xf32>
    %cst_7 = arith.constant 2.000000e-01 : f32
    %10 = vector.broadcast %cst_7 : f32 to vector<64x256xf32>
    %11 = arith.mulf %10, %7 : vector<64x256xf32>
    %12 = arith.select %9, %7, %11 : vector<64x256xi1>, vector<64x256xf32>
    %c0_8 = arith.constant 0 : index
    %c0_9 = arith.constant 0 : index
    %13 = vector.load %arg5[%c0_8, %c0_9] : memref<128x64xbf16, #tpu.memory_space<vmem>>, vector<128x64xbf16>
    %14 = arith.truncf %12 : vector<64x256xf32> to vector<64x256xbf16>
    %cst_10 = arith.constant dense<0.000000e+00> : vector<128x256xf32>
    %15 = tpu.matmul %13, %14, %cst_10 {dimension_numbers = #tpu.dot_dimension_numbers<[1], [0], [0], [1], [0, 0, 1, 1], [], []>} : vector<128x64xbf16>, vector<64x256xbf16>, vector<128x256xf32> -> vector<128x256xf32>
    %cst_11 = arith.constant dense<0.000000e+00> : vector<128xf32>
    %16 = vector.multi_reduction <add>, %15, %cst_11 [1] : vector<128x256xf32> to vector<128xf32>
    %17 = vector.shape_cast %16 : vector<128xf32> to vector<128x1xf32>
    %18 = arith.mulf %15, %15 : vector<128x256xf32>
    %cst_12 = arith.constant dense<0.000000e+00> : vector<128xf32>
    %19 = vector.multi_reduction <add>, %18, %cst_12 [1] : vector<128x256xf32> to vector<128xf32>
    %20 = vector.shape_cast %19 : vector<128xf32> to vector<128x1xf32>
    %c0_i32 = arith.constant 0 : i32
    %21 = arith.cmpi eq, %arg1, %c0_i32 : i32
    %22 = arith.extui %21 : i1 to i32
    %c0_i32_13 = arith.constant 0 : i32
    %23 = arith.cmpi ne, %22, %c0_i32_13 : i32
    scf.if %23 {
      %cst_20 = arith.constant 0.000000e+00 : f32
      %31 = vector.broadcast %cst_20 : f32 to vector<128x2xf32>
      %c0_21 = arith.constant 0 : index
      %c0_22 = arith.constant 0 : index
      %c0_23 = arith.constant 0 : index
      %32 = vector.load %arg6[%c0_21, %c0_22, %c0_23] : memref<1x128x2xf32, #tpu.memory_space<vmem>>, vector<1x128x2xf32>
      %33 = vector.shape_cast %32 : vector<1x128x2xf32> to vector<128x2xf32>
      %34 = vector.shape_cast %31 : vector<128x2xf32> to vector<1x128x2xf32>
      tpu.vector_store %arg6[%c0_21, %c0_22, %c0_23], %34 {strides = array<i32>} : memref<1x128x2xf32, #tpu.memory_space<vmem>>, vector<1x128x2xf32>,
    } else {
    }
    %c0_14 = arith.constant 0 : index
    %c0_15 = arith.constant 0 : index
    %c0_16 = arith.constant 0 : index
    %24 = vector.load %arg6[%c0_14, %c0_15, %c0_16] : memref<1x128x2xf32, #tpu.memory_space<vmem>>, vector<1x128x2xf32>
    %25 = vector.shape_cast %24 : vector<1x128x2xf32> to vector<128x2xf32>
    %26 = tpu.concatenate %17, %20 in 1 : vector<128x1xf32>, vector<128x1xf32> -> vector<128x2xf32>
    %27 = arith.addf %25, %26 : vector<128x2xf32>
    %c0_17 = arith.constant 0 : index
    %c0_18 = arith.constant 0 : index
    %c0_19 = arith.constant 0 : index
    %28 = vector.load %arg6[%c0_17, %c0_18, %c0_19] : memref<1x128x2xf32, #tpu.memory_space<vmem>>, vector<1x128x2xf32>
    %29 = vector.shape_cast %28 : vector<1x128x2xf32> to vector<128x2xf32>
    %30 = vector.shape_cast %27 : vector<128x2xf32> to vector<1x128x2xf32>
    tpu.vector_store %arg6[%c0_17, %c0_18, %c0_19], %30 {strides = array<i32>} : memref<1x128x2xf32, #tpu.memory_space<vmem>>, vector<1x128x2xf32>,
    return
  }
  func.func @transform_0(%arg0: i32, %arg1: i32) -> (i32, i32, i32) {
    %c0_i32 = arith.constant 0 : i32
    %c0_i32_0 = arith.constant 0 : i32
    return %arg0, %c0_i32, %arg1 : i32, i32, i32
  }
  func.func @transform_1(%arg0: i32, %arg1: i32) -> (i32, i32) {
    %c0_i32 = arith.constant 0 : i32
    %c0_i32_0 = arith.constant 0 : i32
    %c0_i32_1 = arith.constant 0 : i32
    return %c0_i32, %c0_i32_0 : i32, i32
  }
  func.func @transform_2(%arg0: i32, %arg1: i32) -> (i32, i32) {
    %c0_i32 = arith.constant 0 : i32
    %c0_i32_0 = arith.constant 0 : i32
    %c0_i32_1 = arith.constant 0 : i32
    return %c0_i32, %c0_i32_0 : i32, i32
  }
  func.func @transform_3(%arg0: i32, %arg1: i32) -> (i32, i32) {
    %c0_i32 = arith.constant 0 : i32
    %c0_i32_0 = arith.constant 0 : i32
    %c0_i32_1 = arith.constant 0 : i32
    return %c0_i32, %c0_i32_0 : i32, i32
  }
  func.func @transform_4(%arg0: i32, %arg1: i32) -> (i32, i32, i32) {
    %c0_i32 = arith.constant 0 : i32
    %c0_i32_0 = arith.constant 0 : i32
    %c0_i32_1 = arith.constant 0 : i32
    return %arg0, %c0_i32, %c0_i32_0 : i32, i32, i32
  }
}

</mosaic_0001>

<bundles_post_ra>
// kernel: tpu_custom_call.1
= control target key start
LH: loop header
LB: loop body
LE: loop exit
PB: predicated region body
PF: predicated region fallthrough
CT: control target
= control target key end

     0   :  { %s1094_s15 = smov 0   ;;  %s1096_s16 = smov 0   ;;  %s1332_s0 = inlined_call_operand.vmem [shape: f32[2,4,256], index: 0, kind: input, shape index: {}]   ;;  %s1333_s1 = inlined_call_operand.vmem [shape: bf16[64,4], index: 1, kind: input, shape index: {}]   ;;  %s1334_s2 = inlined_call_operand.vmem [shape: f32[64,1], index: 2, kind: input, shape index: {}]   ;;  %s1335_s3 = inlined_call_operand.vmem [shape: bf16[128,64], index: 3, kind: input, shape index: {}]   ;;  %s1336_s4 = inlined_call_operand.vmem [shape: f32[2,128,2], index: 4, kind: output, shape index: {}]  }
   0x1   :  { %s1098_s17 = smov 0  }
   0x2 LB: > { %s26_s18 = sadd.s32 1, %s1061_s16  ;;  %p913_p0 = scmp.ge.s32.totalorder %s1065_s17, 1  ;;  %s1065_s17 = sphi %s1098_s17, %s14_s17   ;;  %s1061_s16 = sphi %s1096_s16, %s1338_s16   ;;  %s1057_s15 = sphi %s1094_s15, %s1337_s15  }
   0x3   : > { %p28_p1 = scmp.ge.s32.totalorder %s26_s18, 2  ;;  %p181_p2 = scmp.lt.s32.totalorder %s1065_s17, 3 }
   0x5   : > { %s1340_s18 = smov (%p28_p1, %s26_s18), 0  ;;  %p182_p3 = pnand %p913_p0, %p181_p2 }
   0x6   : > { %p212_p4 = scmp.lt.s32.totalorder (!%p182_p3), %s1057_s15, 1 }
   0x7   : > { %185 = sbr.rel (%p182_p3) target bundleno = 586 (0x24a), region = 36 }
   0xc   : > { %v250_v0 = vld [vmem:[%s1334_s2 + $0x30] sm:$0xff]  ;;  %v1067_v1 = vmov 0   ;;  %v248_v2 = vld [vmem:[%s1334_s2 + $0x20] sm:$0xff]  ;;  %s1342_s15 = smov (!%p212_p4, %s1057_s15), 1  ;;  %v251_v4 = vld [vmem:[%s1334_s2 + $0x38] sm:$0xff]  ;;  %vm325_vm0 = vcmask 1041408  }
   0xd   : > { %1040 = vset.pattern.permute.xlu0 %v1067_v1  ;;  %1041 = vset.pattern.permute.xlu1 %v1067_v1  ;;  %s992_s23 = sshll.u32 %s1342_s15, 3  ;;  %v249_v5 = vld [vmem:[%s1334_s2 + $0x28] sm:$0xff]  ;;  %v244_v10 = vld [vmem:[%s1334_s2] sm:$0xff]  ;;  %vm312_vm1 = vcmask 31744   ;;  %v246_v16 = vld [vmem:[%s1334_s2 + $0x10] sm:$0xff]  ;;  %s993_s19 = sshll.u32 %s1342_s15, 7 }
   0xe   : > { %284 = vperm.xlu0 %1040, %v250_v0   ;;  %274 = vperm.xlu1 %1041, %v248_v2   ;;  %s219_s26 = scalar_lea.vmem %s1332_s0, %s992_s23  ;;  %v245_v11 = vld [vmem:[%s1334_s2 + $0x8] sm:$0xff]  ;;  %v994_v14 = vld [vmem:[%s1333_s1] sm:$0xff]  ;;  %v247_v17 = vld [vmem:[%s1334_s2 + $0x18] sm:$0xff]  ;;  %s1225_s22 = scalar_lea.vmem %s1336_s4, %s993_s19 }
   0xf   : > { %1042 = vset.pattern.permute.xlu2 %v1067_v1  ;;  %v227_v3 = vld [vmem:[%s219_s26] sm:$0xff]  ;;  %v995_v15 = vld [vmem:[%s1333_s1 + $0x8] sm:$0xff]  ;;  %v996_v18 = vld [vmem:[%s1333_s1 + $0x10] sm:$0xff] }
  0x10   : > { %229 = vst [vmem:[#allocation1] ss:$2 sm:$0xff] %v227_v3  ;;  %264 = vperm.xlu2 %1042, %v246_v16   ;;  %v997_v19 = vld [vmem:[%s1333_s1 + $0x18] sm:$0xff] }
  0x16   : > { %289 = vperm.xlu0 %1040, %v251_v4   ;;  %279 = vperm.xlu1 %1041, %v249_v5  }
  0x17   : > { %v230_v6 = vld.sshfl [vmem:[#allocation1] sm:$0xff pattern:$0x75316420]  ;;  %v231_v7 = vld.sshfl [vmem:[#allocation1 + $0x8] sm:$0xff pattern:$0x75316420] }
  0x18   : > { %v234_v8 = vpack.c.bf16 %v230_v6, %v230_v6  ;;  %v235_v9 = vpack.c.bf16 %v231_v7, %v231_v7  ;;  %269 = vperm.xlu2 %1042, %v247_v17  }
  0x1a   : > { %v327_v12 = vsel %vm325_vm0, %v234_v8, 0  ;;  %v330_v13 = vsel %vm325_vm0, %v235_v9, 0 }
  0x1b   : > { %339 = vmatpush.bf16.msra.mxu0 %v327_v12  ;;  %368 = vmatpush.bf16.msra.mxu1 %v330_v13 }
  0x1e   : > { %254 = vperm.xlu0 %1040, %v244_v10   ;;  %259 = vperm.xlu1 %1041, %v245_v11  }
  0x1f   : > { %934 = vmatmul.msk.bf16.vlgmr.msra.gmra.mxu0 %vm312_vm1, %v994_v14  ;;  %938 = vmatmul.msk.bf16.vlgmr.msra.gmra.mxu1 %vm312_vm1, %v994_v14 }
  0x2f   : > { %935 = vmatmul.msk.bf16.gmra.mxu0 %vm312_vm1, %v995_v15  ;;  %939 = vmatmul.msk.bf16.gmra.mxu1 %vm312_vm1, %v995_v15 }
  0x3f   : > { %936 = vmatmul.msk.bf16.gmra.mxu0 %vm312_vm1, %v996_v18  ;;  %940 = vmatmul.msk.bf16.gmra.mxu1 %vm312_vm1, %v996_v18 }
  0x4f   : > { %937 = vmatmul.msk.bf16.gmra.mxu0 %vm312_vm1, %v997_v19  ;;  %941 = vmatmul.msk.bf16.gmra.mxu1 %vm312_vm1, %v997_v19 }
  0x6a   : > { %v265_v35 = vpop.permute.xlu2 %264 }
  0x72   : > { %v270_v40 = vpop.permute.xlu2 %269 }
  0x80   : > { %v285_v28 = vpop.permute.xlu0 %284  ;;  %v275_v31 = vpop.permute.xlu1 %274 }
  0x88   : > { %v290_v34 = vpop.permute.xlu0 %289  ;;  %v280_v38 = vpop.permute.xlu1 %279 }
  0x90   : > { %v255_v39 = vpop.permute.xlu0 %254  ;;  %v260_v61 = vpop.permute.xlu1 %259 }
  0x9c   : > { %v341_v20 = vpop.f32.mrf.mxu0  ;;  %v1162_v21 = vpop.f32.mrf.mxu1 }
  0x9d   : > { %v1164_v44 = vadd.f32 %v341_v20, %v255_v39  ;;  %v371_v13 = vadd.f32 %v1162_v21, %v255_v39  ;;  %v1001_v39 = vld [vmem:[%s1335_s3 + $0x18] sm:$0xff] }
  0x9f   : > { %vm390_vm0 = vcmp.ge.f32.partialorder %v1164_v44, 0.0  ;;  %vm391_vm1 = vcmp.ge.f32.partialorder %v371_v13, 0.0 }
  0xa4   : > { %v343_v22 = vpop.f32.mrf.mxu0  ;;  %v372_v23 = vpop.f32.mrf.mxu1 }
  0xa5   : > { %v344_v7 = vadd.f32 %v343_v22, %v260_v61  ;;  %v373_v10 = vadd.f32 %v372_v23, %v260_v61 }
  0xa7   : > { %v408_v19 = vmul.f32 0.2, %v344_v7  ;;  %v409_v23 = vmul.f32 0.2, %v373_v10  ;;  %vm392_vm14 = vcmp.ge.f32.partialorder %v344_v7, 0.0  ;;  %vm393_vm15 = vcmp.ge.f32.partialorder %v373_v10, 0.0 }
  0xac   : > { %v346_v24 = vpop.f32.mrf.mxu0  ;;  %v375_v25 = vpop.f32.mrf.mxu1 }
  0xad   : > { %v1166_v45 = vadd.f32 %v346_v24, %v265_v35  ;;  %v1168_v46 = vadd.f32 %v375_v25, %v265_v35  ;;  %v406_v24 = vmul.f32 0.2, %v1164_v44 }
  0xaf   : > { %v410_v14 = vmul.f32 0.2, %v1166_v45  ;;  %v411_v16 = vmul.f32 0.2, %v1168_v46  ;;  %vm394_vm12 = vcmp.ge.f32.partialorder %v1166_v45, 0.0  ;;  %vm395_vm13 = vcmp.ge.f32.partialorder %v1168_v46, 0.0 }
  0xb1   : > { %v426_v25 = vsel %vm394_vm12, %v1166_v45, %v410_v14 }
  0xb4   : > { %v348_v26 = vpop.f32.mrf.mxu0  ;;  %v377_v27 = vpop.f32.mrf.mxu1 }
  0xb5   : > { %v349_v47 = vadd.f32 %v348_v26, %v270_v40  ;;  %v378_v48 = vadd.f32 %v377_v27, %v270_v40  ;;  %v407_v26 = vmul.f32 0.2, %v371_v13  ;;  %v1002_v40 = vld [vmem:[%s1335_s3 + $0x20] sm:$0xff] }
  0xb7   : > { %v412_v8 = vmul.f32 0.2, %v349_v47  ;;  %v413_v11 = vmul.f32 0.2, %v378_v48  ;;  %vm396_vm10 = vcmp.ge.f32.partialorder %v349_v47, 0.0  ;;  %vm397_vm11 = vcmp.ge.f32.partialorder %v378_v48, 0.0 }
  0xb9   : > { %v428_v22 = vsel %vm396_vm10, %v349_v47, %v412_v8  ;;  %v429_v21 = vsel %vm397_vm11, %v378_v48, %v413_v11 }
  0xba   : > { %v456_v27 = vpack.c.bf16 %v428_v22, %v426_v25 }
  0xbc   : > { %v351_v29 = vpop.f32.mrf.mxu0  ;;  %v380_v30 = vpop.f32.mrf.mxu1 }
  0xbd   : > { %v352_v49 = vadd.f32 %v351_v29, %v275_v31  ;;  %v381_v57 = vadd.f32 %v380_v30, %v275_v31  ;;  %v424_v30 = vsel %vm392_vm14, %v344_v7, %v408_v19  ;;  %v425_v31 = vsel %vm393_vm15, %v373_v10, %v409_v23 }
  0xbf   : > { %v414_v62 = vmul.f32 0.2, %v352_v49  ;;  %v415_v4 = vmul.f32 0.2, %v381_v57  ;;  %vm398_vm8 = vcmp.ge.f32.partialorder %v352_v49, 0.0  ;;  %vm399_vm9 = vcmp.ge.f32.partialorder %v381_v57, 0.0 }
  0xc1   : > { %v430_v15 = vsel %vm398_vm8, %v352_v49, %v414_v62  ;;  %v431_v18 = vsel %vm399_vm9, %v381_v57, %v415_v4 }
  0xc4   : > { %v353_v32 = vpop.f32.mrf.mxu0  ;;  %v382_v33 = vpop.f32.mrf.mxu1 }
  0xc5   : > { %v354_v43 = vadd.f32 %v353_v32, %v280_v38  ;;  %v383_v50 = vadd.f32 %v382_v33, %v280_v38  ;;  %v422_v32 = vsel %vm390_vm0, %v1164_v44, %v406_v24  ;;  %v999_v38 = vld [vmem:[%s1335_s3 + $0x8] sm:$0xff] }
  0xc6   : > { %v454_v33 = vpack.c.bf16 %v424_v30, %v422_v32 }
  0xc7   : > { %v416_v58 = vmul.f32 0.2, %v354_v43  ;;  %v417_v63 = vmul.f32 0.2, %v383_v50  ;;  %vm400_vm6 = vcmp.ge.f32.partialorder %v354_v43, 0.0  ;;  %vm401_vm7 = vcmp.ge.f32.partialorder %v383_v50, 0.0 }
  0xc9   : > { %v432_v9 = vsel %vm400_vm6, %v354_v43, %v416_v58  ;;  %v433_v12 = vsel %vm401_vm7, %v383_v50, %v417_v63  ;;  %v1005_v43 = vld [vmem:[%s1335_s3 + $0x38] sm:$0xff] }
  0xca   : > { %v458_v17 = vpack.c.bf16 %v432_v9, %v430_v15  ;;  %v459_v20 = vpack.c.bf16 %v433_v12, %v431_v18 }
  0xcc   : > { %v356_v36 = vpop.f32.mrf.mxu0  ;;  %v385_v37 = vpop.f32.mrf.mxu1 }
  0xcd   : > { %v357_v41 = vadd.f32 %v356_v36, %v285_v28  ;;  %v386_v42 = vadd.f32 %v385_v37, %v285_v28  ;;  %v427_v28 = vsel %vm395_vm13, %v1168_v46, %v411_v16  ;;  %v998_v36 = vld [vmem:[%s1335_s3] sm:$0xff]  ;;  %v1000_v37 = vld [vmem:[%s1335_s3 + $0x10] sm:$0xff] }
  0xce   : > { %v457_v29 = vpack.c.bf16 %v429_v21, %v427_v28 }
  0xcf   : > { %v418_v53 = vmul.f32 0.2, %v357_v41  ;;  %v419_v54 = vmul.f32 0.2, %v386_v42  ;;  %vm402_vm2 = vcmp.ge.f32.partialorder %v357_v41, 0.0  ;;  %vm403_vm3 = vcmp.ge.f32.partialorder %v386_v42, 0.0 }
  0xd1   : > { %v434_v0 = vsel %vm402_vm2, %v357_v41, %v418_v53  ;;  %v435_v2 = vsel %vm403_vm3, %v386_v42, %v419_v54  ;;  %vm502_vm2 = vcmask 523264   ;;  %v1003_v41 = vld [vmem:[%s1335_s3 + $0x28] sm:$0xff]  ;;  %v1004_v42 = vld [vmem:[%s1335_s3 + $0x30] sm:$0xff]  ;;  %vm757_vm3 = vcmask 15360  }
  0xd4   : > { %v358_v51 = vpop.f32.mrf.mxu0  ;;  %v387_v52 = vpop.f32.mrf.mxu1 }
  0xd5   : > { %v359_v55 = vadd.f32 %v358_v51, %v290_v34  ;;  %v388_v56 = vadd.f32 %v387_v52, %v290_v34  ;;  %v423_v34 = vsel %vm391_vm1, %v371_v13, %v407_v26 }
  0xd6   : > { %v455_v35 = vpack.c.bf16 %v425_v31, %v423_v34 }
  0xd7   : > { %v420_v59 = vmul.f32 0.2, %v359_v55  ;;  %v421_v60 = vmul.f32 0.2, %v388_v56  ;;  %vm404_vm4 = vcmp.ge.f32.partialorder %v359_v55, 0.0  ;;  %vm405_vm5 = vcmp.ge.f32.partialorder %v388_v56, 0.0 }
  0xd9   : > { %v436_v1 = vsel %vm404_vm4, %v359_v55, %v420_v59  ;;  %v437_v3 = vsel %vm405_vm5, %v388_v56, %v421_v60  ;;  %vm790_vm4 = vcmask 7168  }
  0xda   : > { %v460_v5 = vpack.c.bf16 %v436_v1, %v434_v0  ;;  %v461_v6 = vpack.c.bf16 %v437_v3, %v435_v2 }
  0xdc   : > { %531 = vmatpush.bf16.msrb.mxu0 %v460_v5  ;;  %1006 = vmatpush.bf16.msra.mxu2 %v460_v5 }
  0xdd   : > { %580 = vmatpush.bf16.msrb.mxu1 %v461_v6  ;;  %1010 = vmatpush.bf16.msra.mxu3 %v461_v6 }
  0xe0   : > { %532 = vmatpush.bf16.msrb.mxu0 %v458_v17  ;;  %1007 = vmatpush.bf16.msra.mxu2 %v458_v17 }
  0xe1   : > { %581 = vmatpush.bf16.msrb.mxu1 %v459_v20  ;;  %1011 = vmatpush.bf16.msra.mxu3 %v459_v20 }
  0xe4   : > { %533 = vmatpush.bf16.msrb.mxu0 %v456_v27  ;;  %1008 = vmatpush.bf16.msra.mxu2 %v456_v27 }
  0xe5   : > { %582 = vmatpush.bf16.msrb.mxu1 %v457_v29  ;;  %1012 = vmatpush.bf16.msra.mxu3 %v457_v29 }
  0xe8   : > { %534 = vmatpush.bf16.msrb.mxu0 %v454_v33  ;;  %1009 = vmatpush.bf16.msra.mxu2 %v454_v33 }
  0xe9   : > { %583 = vmatpush.bf16.msrb.mxu1 %v455_v35  ;;  %1013 = vmatpush.bf16.msra.mxu3 %v455_v35 }
  0xeb   : > { %974 = vmatmul.msk.bf16.vlgmr.msrb.gmra.mxu0 %vm502_vm2, %v998_v36  ;;  %976 = vmatmul.msk.bf16.vlgmr.msra.gmra.mxu2 %vm502_vm2, %v1000_v37 }
  0xec   : > { %982 = vmatmul.msk.bf16.vlgmr.msrb.gmra.mxu1 %vm502_vm2, %v998_v36  ;;  %984 = vmatmul.msk.bf16.vlgmr.msra.gmra.mxu3 %vm502_vm2, %v1000_v37 }
  0xfb   : > { %975 = vmatmul.msk.bf16.gmra.mxu0 %vm502_vm2, %v999_v38  ;;  %977 = vmatmul.msk.bf16.gmra.mxu2 %vm502_vm2, %v1001_v39 }
  0xfc   : > { %983 = vmatmul.msk.bf16.gmra.mxu1 %vm502_vm2, %v999_v38  ;;  %985 = vmatmul.msk.bf16.gmra.mxu3 %vm502_vm2, %v1001_v39 }
 0x10b   : > { %978 = vmatmul.msk.bf16.gmra.mxu2 %vm502_vm2, %v1002_v40 }
 0x10c   : > { %986 = vmatmul.msk.bf16.gmra.mxu3 %vm502_vm2, %v1002_v40 }
 0x11b   : > { %979 = vmatmul.msk.bf16.gmra.mxu2 %vm502_vm2, %v1003_v41 }
 0x11c   : > { %987 = vmatmul.msk.bf16.gmra.mxu3 %vm502_vm2, %v1003_v41 }
 0x12b   : > { %980 = vmatmul.msk.bf16.gmra.mxu2 %vm502_vm2, %v1004_v42 }
 0x12c   : > { %988 = vmatmul.msk.bf16.gmra.mxu3 %vm502_vm2, %v1004_v42 }
 0x13b   : > { %981 = vmatmul.msk.bf16.gmra.mxu2 %vm502_vm2, %v1005_v43 }
 0x13c   : > { %989 = vmatmul.msk.bf16.gmra.mxu3 %vm502_vm2, %v1005_v43 }
 0x168   : > { %v536_v44 = vpop.f32.mrf.mxu0 }
 0x169   : > { %v585_v45 = vpop.f32.mrf.mxu1  ;;  %v673_v47 = vmul.f32 %v536_v44, %v536_v44 }
 0x16a   : > { %v625_v46 = vadd.f32 %v585_v45, %v536_v44  ;;  %v674_v48 = vmul.f32 %v585_v45, %v585_v45 }
 0x16c   : > { %626 = vadd.xlane.f32.xlu2 %v625_v46  ;;  %v705_v52 = vadd.f32 %v674_v48, %v673_v47 }
 0x16e   : > { %v546_v49 = vpop.f32.mrf.mxu2 }
 0x16f   : > { %v595_v50 = vpop.f32.mrf.mxu3  ;;  %v681_v55 = vmul.f32 %v546_v49, %v546_v49 }
 0x170   : > { %v538_v51 = vpop.f32.mrf.mxu0  ;;  %v682_v56 = vmul.f32 %v595_v50, %v595_v50  ;;  %v637_v61 = vadd.f32 %v595_v50, %v546_v49 }
 0x171   : > { %v587_v53 = vpop.f32.mrf.mxu1  ;;  %v675_v0 = vmul.f32 %v538_v51, %v538_v51 }
 0x172   : > { %v628_v54 = vadd.f32 %v587_v53, %v538_v51  ;;  %v717_v62 = vadd.f32 %v682_v56, %v681_v55  ;;  %v676_v1 = vmul.f32 %v587_v53, %v587_v53 }
 0x174   : > { %706 = vadd.xlane.f32.xlu2 %v705_v52  ;;  %629 = vadd.xlane.f32.xlu0 %v628_v54  ;;  %v708_v9 = vadd.f32 %v676_v1, %v675_v0  ;;  %v1068_v0 = vmov 0.0  }
 0x175   : > { %758 = vst.msk [vmem:[%s1225_s22] sm:$0xff] %vm757_vm3, %v1068_v0 }
 0x176   : > { %v548_v57 = vpop.f32.mrf.mxu2  ;;  %759 = vst.msk [vmem:[%s1225_s22 + $0x8] sm:$0xff] %vm757_vm3, %v1068_v0 }
 0x177   : > { %v597_v58 = vpop.f32.mrf.mxu3  ;;  %v683_v3 = vmul.f32 %v548_v57, %v548_v57  ;;  %760 = vst.msk [vmem:[%s1225_s22 + $0x10] sm:$0xff] %vm757_vm3, %v1068_v0 }
 0x178   : > { %v541_v59 = vpop.f32.mrf.mxu0  ;;  %v684_v4 = vmul.f32 %v597_v58, %v597_v58  ;;  %v640_v18 = vadd.f32 %v597_v58, %v548_v57  ;;  %761 = vst.msk [vmem:[%s1225_s22 + $0x18] sm:$0xff] %vm757_vm3, %v1068_v0 }
 0x179   : > { %v590_v60 = vpop.f32.mrf.mxu1  ;;  %v677_v11 = vmul.f32 %v541_v59, %v541_v59  ;;  %762 = vst.msk [vmem:[%s1225_s22 + $0x20] sm:$0xff] %vm757_vm3, %v1068_v0 }
 0x17a   : > { %v631_v63 = vadd.f32 %v590_v60, %v541_v59  ;;  %v720_v10 = vadd.f32 %v684_v4, %v683_v3  ;;  %v678_v12 = vmul.f32 %v590_v60, %v590_v60  ;;  %763 = vst.msk [vmem:[%s1225_s22 + $0x28] sm:$0xff] %vm757_vm3, %v1068_v0 }
 0x17b   : > { %764 = vst.msk [vmem:[%s1225_s22 + $0x30] sm:$0xff] %vm757_vm3, %v1068_v0 }
 0x17c   : > { %638 = vadd.xlane.f32.xlu2 %v637_v61  ;;  %718 = vadd.xlane.f32.xlu0 %v717_v62  ;;  %v711_v17 = vadd.f32 %v678_v12, %v677_v11  ;;  %765 = vst.msk [vmem:[%s1225_s22 + $0x38] sm:$0xff] %vm757_vm3, %v1068_v0 }
 0x17d   : > { %632 = vadd.xlane.f32.xlu1 %v631_v63  ;;  %766 = vst.msk [vmem:[%s1225_s22 + $0x40] sm:$0xff] %vm757_vm3, %v1068_v0 }
 0x17e   : > { %v551_v2 = vpop.f32.mrf.mxu2  ;;  %767 = vst.msk [vmem:[%s1225_s22 + $0x48] sm:$0xff] %vm757_vm3, %v1068_v0 }
 0x17f   : > { %v600_v5 = vpop.f32.mrf.mxu3  ;;  %v685_v13 = vmul.f32 %v551_v2, %v551_v2  ;;  %768 = vst.msk [vmem:[%s1225_s22 + $0x50] sm:$0xff] %vm757_vm3, %v1068_v0 }
 0x180   : > { %v543_v6 = vpop.f32.mrf.mxu0  ;;  %v686_v14 = vmul.f32 %v600_v5, %v600_v5  ;;  %v643_v28 = vadd.f32 %v600_v5, %v551_v2  ;;  %769 = vst.msk [vmem:[%s1225_s22 + $0x58] sm:$0xff] %vm757_vm3, %v1068_v0 }
 0x181   : > { %v592_v7 = vpop.f32.mrf.mxu1  ;;  %v679_v20 = vmul.f32 %v543_v6, %v543_v6  ;;  %770 = vst.msk [vmem:[%s1225_s22 + $0x60] sm:$0xff] %vm757_vm3, %v1068_v0 }
 0x182   : > { %v634_v8 = vadd.f32 %v592_v7, %v543_v6  ;;  %v723_v19 = vadd.f32 %v686_v14, %v685_v13  ;;  %v680_v22 = vmul.f32 %v592_v7, %v592_v7  ;;  %771 = vst.msk [vmem:[%s1225_s22 + $0x68] sm:$0xff] %vm757_vm3, %v1068_v0  ;;  %v774_v14 = vld [vmem:[%s1225_s22] sm:$0xff] }
 0x183   : > { %772 = vst.msk [vmem:[%s1225_s22 + $0x70] sm:$0xff] %vm757_vm3, %v1068_v0 }
 0x184   : > { %709 = vadd.xlane.f32.xlu0 %v708_v9  ;;  %635 = vadd.xlane.f32.xlu2 %v634_v8  ;;  %v714_v26 = vadd.f32 %v680_v22, %v679_v20  ;;  %773 = vst.msk [vmem:[%s1225_s22 + $0x78] sm:$0xff] %vm757_vm3, %v1068_v0 }
 0x185   : > { %721 = vadd.xlane.f32.xlu1 %v720_v10 }
 0x186   : > { %v553_v15 = vpop.f32.mrf.mxu2  ;;  %v784_v0 = vld [vmem:[%s1225_s22 + $0x50] sm:$0xff] }
 0x187   : > { %v602_v16 = vpop.f32.mrf.mxu3  ;;  %v687_v23 = vmul.f32 %v553_v15, %v553_v15 }
 0x188   : > { %v688_v21 = vmul.f32 %v602_v16, %v602_v16  ;;  %v646_v33 = vadd.f32 %v602_v16, %v553_v15 }
 0x18a   : > { %v726_v27 = vadd.f32 %v688_v21, %v687_v23 }
 0x18c   : > { %641 = vadd.xlane.f32.xlu0 %v640_v18  ;;  %724 = vadd.xlane.f32.xlu2 %v723_v19  ;;  %v778_v19 = vld [vmem:[%s1225_s22 + $0x20] sm:$0xff] }
 0x18d   : > { %712 = vadd.xlane.f32.xlu1 %v711_v17 }
 0x18e   : > { %v556_v24 = vpop.f32.mrf.mxu2 }
 0x18f   : > { %v605_v25 = vpop.f32.mrf.mxu3  ;;  %v689_v30 = vmul.f32 %v556_v24, %v556_v24 }
 0x190   : > { %v690_v31 = vmul.f32 %v605_v25, %v605_v25  ;;  %v649_v34 = vadd.f32 %v605_v25, %v556_v24  ;;  %v775_v25 = vld [vmem:[%s1225_s22 + $0x8] sm:$0xff] }
 0x192   : > { %v729_v35 = vadd.f32 %v690_v31, %v689_v30  ;;  %v779_v31 = vld [vmem:[%s1225_s22 + $0x28] sm:$0xff] }
 0x194   : > { %715 = vadd.xlane.f32.xlu2 %v714_v26  ;;  %727 = vadd.xlane.f32.xlu0 %v726_v27 }
 0x195   : > { %644 = vadd.xlane.f32.xlu1 %v643_v28 }
 0x196   : > { %v558_v29 = vpop.f32.mrf.mxu2 }
 0x197   : > { %v607_v32 = vpop.f32.mrf.mxu3  ;;  %v691_v36 = vmul.f32 %v558_v29, %v558_v29 }
 0x198   : > { %v692_v37 = vmul.f32 %v607_v32, %v607_v32  ;;  %v652_v44 = vadd.f32 %v607_v32, %v558_v29 }
 0x19a   : > { %v732_v42 = vadd.f32 %v692_v37, %v691_v36 }
 0x19c   : > { %647 = vadd.xlane.f32.xlu2 %v646_v33  ;;  %650 = vadd.xlane.f32.xlu0 %v649_v34  ;;  %v776_v34 = vld [vmem:[%s1225_s22 + $0x10] sm:$0xff] }
 0x19d   : > { %730 = vadd.xlane.f32.xlu1 %v729_v35 }
 0x19e   : > { %v561_v38 = vpop.f32.mrf.mxu2 }
 0x19f   : > { %v693_v39 = vmul.f32 %v561_v38, %v561_v38  ;;  %v610_v40 = vpop.f32.mrf.mxu3 }
 0x1a0   : > { %v694_v41 = vmul.f32 %v610_v40, %v610_v40  ;;  %v655_v51 = vadd.f32 %v610_v40, %v561_v38  ;;  %v777_v40 = vld [vmem:[%s1225_s22 + $0x18] sm:$0xff] }
 0x1a2   : > { %v735_v43 = vadd.f32 %v694_v41, %v693_v39 }
 0x1a4   : > { %733 = vadd.xlane.f32.xlu2 %v732_v42  ;;  %736 = vadd.xlane.f32.xlu0 %v735_v43  ;;  %v780_v43 = vld [vmem:[%s1225_s22 + $0x30] sm:$0xff] }
 0x1a5   : > { %653 = vadd.xlane.f32.xlu1 %v652_v44 }
 0x1a6   : > { %v563_v45 = vpop.f32.mrf.mxu2 }
 0x1a7   : > { %v695_v46 = vmul.f32 %v563_v45, %v563_v45  ;;  %v612_v47 = vpop.f32.mrf.mxu3 }
 0x1a8   : > { %v696_v48 = vmul.f32 %v612_v47, %v612_v47  ;;  %v658_v49 = vadd.f32 %v612_v47, %v563_v45 }
 0x1aa   : > { %v738_v50 = vadd.f32 %v696_v48, %v695_v46 }
 0x1ac   : > { %659 = vadd.xlane.f32.xlu0 %v658_v49  ;;  %656 = vadd.xlane.f32.xlu2 %v655_v51  ;;  %v781_v49 = vld [vmem:[%s1225_s22 + $0x38] sm:$0xff]  ;;  %v782_v51 = vld [vmem:[%s1225_s22 + $0x40] sm:$0xff] }
 0x1ad   : > { %739 = vadd.xlane.f32.xlu1 %v738_v50 }
 0x1ae   : > { %v566_v52 = vpop.f32.mrf.mxu2 }
 0x1af   : > { %v697_v53 = vmul.f32 %v566_v52, %v566_v52  ;;  %v615_v54 = vpop.f32.mrf.mxu3 }
 0x1b0   : > { %v698_v55 = vmul.f32 %v615_v54, %v615_v54  ;;  %v661_v57 = vadd.f32 %v615_v54, %v566_v52 }
 0x1b2   : > { %v741_v56 = vadd.f32 %v698_v55, %v697_v53 }
 0x1b4   : > { %742 = vadd.xlane.f32.xlu2 %v741_v56 }
 0x1b5   : > { %662 = vadd.xlane.f32.xlu1 %v661_v57 }
 0x1b6   : > { %v568_v58 = vpop.f32.mrf.mxu2 }
 0x1b7   : > { %v617_v59 = vpop.f32.mrf.mxu3  ;;  %v699_v1 = vmul.f32 %v568_v58, %v568_v58 }
 0x1b8   : > { %v664_v60 = vadd.f32 %v617_v59, %v568_v58  ;;  %v700_v2 = vmul.f32 %v617_v59, %v617_v59  ;;  %v783_v58 = vld [vmem:[%s1225_s22 + $0x48] sm:$0xff] }
 0x1ba   : > { %v744_v6 = vadd.f32 %v700_v2, %v699_v1  ;;  %v785_v2 = vld [vmem:[%s1225_s22 + $0x58] sm:$0xff] }
 0x1bc   : > { %665 = vadd.xlane.f32.xlu2 %v664_v60 }
 0x1be   : > { %v571_v61 = vpop.f32.mrf.mxu2 }
 0x1bf   : > { %v620_v62 = vpop.f32.mrf.mxu3  ;;  %v701_v10 = vmul.f32 %v571_v61, %v571_v61 }
 0x1c0   : > { %v667_v63 = vadd.f32 %v620_v62, %v571_v61  ;;  %v702_v11 = vmul.f32 %v620_v62, %v620_v62 }
 0x1c2   : > { %668 = vadd.xlane.f32.xlu0 %v667_v63  ;;  %v747_v12 = vadd.f32 %v702_v11, %v701_v10  ;;  %v786_v10 = vld [vmem:[%s1225_s22 + $0x60] sm:$0xff] }
 0x1c6   : > { %v573_v3 = vpop.f32.mrf.mxu2 }
 0x1c7   : > { %v703_v4 = vmul.f32 %v573_v3, %v573_v3  ;;  %v622_v5 = vpop.f32.mrf.mxu3 }
 0x1c8   : > { %v670_v7 = vadd.f32 %v622_v5, %v573_v3  ;;  %v704_v8 = vmul.f32 %v622_v5, %v622_v5 }
 0x1ca   : > { %745 = vadd.xlane.f32.xlu0 %v744_v6  ;;  %671 = vadd.xlane.f32.xlu1 %v670_v7  ;;  %v750_v9 = vadd.f32 %v704_v8, %v703_v4 }
 0x1cc   : > { %751 = vadd.xlane.f32.xlu2 %v750_v9 }
 0x1d2   : > { %748 = vadd.xlane.f32.xlu1 %v747_v12 }
 0x1df   : > { %v627_v13 = vpop.xlane.xlu2 %626 }
 0x1e7   : > { %v707_v15 = vpop.xlane.xlu2 %706  ;;  %v630_v16 = vpop.xlane.xlu0 %629 }
 0x1e8   : > { %v791_v17 = vsel %vm790_vm4, %v627_v13, %v707_v15 }
 0x1e9   : > { %v807_v18 = vadd.f32 %v791_v17, %v774_v14 }
 0x1eb   : > { %824 = vst.msk [vmem:[%s1225_s22] sm:$0xff] %vm757_vm3, %v807_v18 }
 0x1ef   : > { %v639_v20 = vpop.xlane.xlu2 %638  ;;  %v719_v22 = vpop.xlane.xlu0 %718 }
 0x1f0   : > { %v795_v23 = vsel %vm790_vm4, %v639_v20, %v719_v22  ;;  %v633_v21 = vpop.xlane.xlu1 %632  ;;  %v789_v20 = vld [vmem:[%s1225_s22 + $0x78] sm:$0xff] }
 0x1f1   : > { %v811_v24 = vadd.f32 %v795_v23, %v778_v19 }
 0x1f3   : > { %828 = vst.msk [vmem:[%s1225_s22 + $0x20] sm:$0xff] %vm757_vm3, %v811_v24 }
 0x1f7   : > { %v710_v26 = vpop.xlane.xlu0 %709  ;;  %v636_v27 = vpop.xlane.xlu2 %635 }
 0x1f8   : > { %v792_v28 = vsel %vm790_vm4, %v630_v16, %v710_v26  ;;  %v722_v29 = vpop.xlane.xlu1 %721  ;;  %v787_v16 = vld [vmem:[%s1225_s22 + $0x68] sm:$0xff] }
 0x1f9   : > { %v808_v30 = vadd.f32 %v792_v28, %v775_v25  ;;  %v788_v25 = vld [vmem:[%s1225_s22 + $0x70] sm:$0xff] }
 0x1fb   : > { %825 = vst.msk [vmem:[%s1225_s22 + $0x8] sm:$0xff] %vm757_vm3, %v808_v30 }
 0x1ff   : > { %v642_v32 = vpop.xlane.xlu0 %641  ;;  %v725_v33 = vpop.xlane.xlu2 %724 }
 0x200   : > { %v796_v35 = vsel %vm790_vm4, %v642_v32, %v722_v29  ;;  %v713_v36 = vpop.xlane.xlu1 %712 }
 0x201   : > { %v812_v37 = vadd.f32 %v796_v35, %v779_v31  ;;  %v793_v38 = vsel %vm790_vm4, %v633_v21, %v713_v36 }
 0x202   : > { %v809_v39 = vadd.f32 %v793_v38, %v776_v34 }
 0x203   : > { %829 = vst.msk [vmem:[%s1225_s22 + $0x28] sm:$0xff] %vm757_vm3, %v812_v37 }
 0x204   : > { %826 = vst.msk [vmem:[%s1225_s22 + $0x10] sm:$0xff] %vm757_vm3, %v809_v39 }
 0x207   : > { %v716_v41 = vpop.xlane.xlu2 %715  ;;  %v728_v42 = vpop.xlane.xlu0 %727 }
 0x208   : > { %v794_v44 = vsel %vm790_vm4, %v636_v27, %v716_v41  ;;  %v645_v45 = vpop.xlane.xlu1 %644 }
 0x209   : > { %v810_v46 = vadd.f32 %v794_v44, %v777_v40  ;;  %v797_v47 = vsel %vm790_vm4, %v645_v45, %v725_v33 }
 0x20a   : > { %v813_v48 = vadd.f32 %v797_v47, %v780_v43 }
 0x20b   : > { %827 = vst.msk [vmem:[%s1225_s22 + $0x18] sm:$0xff] %vm757_vm3, %v810_v46 }
 0x20c   : > { %830 = vst.msk [vmem:[%s1225_s22 + $0x30] sm:$0xff] %vm757_vm3, %v813_v48 }
 0x20f   : > { %v648_v50 = vpop.xlane.xlu2 %647  ;;  %v651_v52 = vpop.xlane.xlu0 %650 }
 0x210   : > { %v798_v53 = vsel %vm790_vm4, %v648_v50, %v728_v42  ;;  %v731_v54 = vpop.xlane.xlu1 %730 }
 0x211   : > { %v814_v55 = vadd.f32 %v798_v53, %v781_v49  ;;  %v799_v56 = vsel %vm790_vm4, %v651_v52, %v731_v54 }
 0x212   : > { %v815_v57 = vadd.f32 %v799_v56, %v782_v51 }
 0x213   : > { %831 = vst.msk [vmem:[%s1225_s22 + $0x38] sm:$0xff] %vm757_vm3, %v814_v55 }
 0x214   : > { %832 = vst.msk [vmem:[%s1225_s22 + $0x40] sm:$0xff] %vm757_vm3, %v815_v57 }
 0x217   : > { %v734_v59 = vpop.xlane.xlu2 %733  ;;  %v737_v60 = vpop.xlane.xlu0 %736 }
 0x218   : > { %v654_v61 = vpop.xlane.xlu1 %653 }
 0x219   : > { %v800_v62 = vsel %vm790_vm4, %v654_v61, %v734_v59 }
 0x21a   : > { %v816_v63 = vadd.f32 %v800_v62, %v783_v58 }
 0x21c   : > { %833 = vst.msk [vmem:[%s1225_s22 + $0x48] sm:$0xff] %vm757_vm3, %v816_v63 }
 0x21f   : > { %v660_v1 = vpop.xlane.xlu0 %659  ;;  %v657_v3 = vpop.xlane.xlu2 %656 }
 0x220   : > { %v740_v4 = vpop.xlane.xlu1 %739  ;;  %v801_v5 = vsel %vm790_vm4, %v657_v3, %v737_v60 }
 0x221   : > { %v802_v6 = vsel %vm790_vm4, %v660_v1, %v740_v4  ;;  %v817_v7 = vadd.f32 %v801_v5, %v784_v0 }
 0x222   : > { %v818_v8 = vadd.f32 %v802_v6, %v785_v2 }
 0x223   : > { %834 = vst.msk [vmem:[%s1225_s22 + $0x50] sm:$0xff] %vm757_vm3, %v817_v7 }
 0x224   : > { %835 = vst.msk [vmem:[%s1225_s22 + $0x58] sm:$0xff] %vm757_vm3, %v818_v8 }
 0x227   : > { %v743_v9 = vpop.xlane.xlu2 %742 }
 0x228   : > { %v663_v11 = vpop.xlane.xlu1 %662 }
 0x229   : > { %v803_v12 = vsel %vm790_vm4, %v663_v11, %v743_v9 }
 0x22a   : > { %v819_v13 = vadd.f32 %v803_v12, %v786_v10 }
 0x22c   : > { %836 = vst.msk [vmem:[%s1225_s22 + $0x60] sm:$0xff] %vm757_vm3, %v819_v13 }
 0x22f   : > { %v666_v15 = vpop.xlane.xlu2 %665 }
 0x235   : > { %v669_v14 = vpop.xlane.xlu0 %668 }
 0x23d   : > { %v746_v17 = vpop.xlane.xlu0 %745  ;;  %v672_v18 = vpop.xlane.xlu1 %671 }
 0x23e   : > { %v804_v19 = vsel %vm790_vm4, %v666_v15, %v746_v17 }
 0x23f   : > { %v820_v22 = vadd.f32 %v804_v19, %v787_v16  ;;  %v752_v23 = vpop.xlane.xlu2 %751 }
 0x240   : > { %v806_v21 = vsel %vm790_vm4, %v672_v18, %v752_v23 }
 0x241   : > { %837 = vst.msk [vmem:[%s1225_s22 + $0x68] sm:$0xff] %vm757_vm3, %v820_v22  ;;  %v822_v24 = vadd.f32 %v806_v21, %v789_v20 }
 0x243   : > { %839 = vst.msk [vmem:[%s1225_s22 + $0x78] sm:$0xff] %vm757_vm3, %v822_v24 }
 0x245   : > { %v749_v26 = vpop.xlane.xlu1 %748 }
 0x246   : > { %v805_v27 = vsel %vm790_vm4, %v669_v14, %v749_v26 }
 0x247   : > { %v821_v28 = vadd.f32 %v805_v27, %v788_v25 }
 0x249   : > { %838 = vst.msk [vmem:[%s1225_s22 + $0x70] sm:$0xff] %vm757_vm3, %v821_v28 }
 0x24a PF: > { %s14_s17 = sadd.s32 1, %s1065_s17   ;;  %s1337_s15 = smov %s1061_s16 }
 0x24b   : > { %p11_p5 = scmp.ge.s32.totalorder %s14_s17, 4   ;;  %s1338_s16 = smov %s1340_s18 }
 0x24d   :  { %13 = sbr.rel (!%p11_p5) target bundleno = 2 (0x2), region = 70 }

</bundles_post_ra>
